<compile_context>
chip_gen: v6e
topology: v6e:2x2x1
jax: 0.10.0
libtpu: 0.0.40
codegen_flags: <defaults>
</compile_context>

<pallas_src>
import functools

import jax
import jax.numpy as jnp
from jax import lax
from jax.experimental import pallas as pl
from jax.experimental.pallas import tpu as pltpu


def _fused_cross_attn_kernel(x_ref, ctx_ref, wq_ref, wk_ref, wv_ref, wo_ref, bo_ref,
                             o_ref, o_cat_ref, *, heads, dim_head, scale,
                             compute_dtype):
    cd = compute_dtype
    x = x_ref[0]                        # (Nq, Dq)
    c = ctx_ref[0]                      # (Nk, Dc)

    # Full-width projections (wide MXU matmuls, f32 accumulation).
    # Softmax scale folded into q ONCE (hoisted out of the head loop).
    q = jnp.dot(x.astype(cd), wq_ref[...].astype(cd),
                preferred_element_type=jnp.float32) * scale        # (Nq, inner)
    k = jnp.dot(c.astype(cd), wk_ref[...].astype(cd),
                preferred_element_type=jnp.float32)                # (Nk, inner)
    v = jnp.dot(c.astype(cd), wv_ref[...].astype(cd),
                preferred_element_type=jnp.float32)                # (Nk, inner)

    # Cast once so every per-head matmul (QK^T and PV) runs with compute_dtype
    # operands on the MXU (bf16 on v6e/v7x), f32 accumulation.
    q = q.astype(cd)
    k = k.astype(cd)
    v = v.astype(cd)

    for h in range(heads):
        lo = h * dim_head
        qh = q[:, lo:lo + dim_head]                                # (Nq, dh)
        kh = k[:, lo:lo + dim_head]                                # (Nk, dh)
        vh = v[:, lo:lo + dim_head]                                # (Nk, dh)

        # sim = q_h . k_h^T without an explicit transpose (contract dim 1 of both).
        sim = lax.dot_general(qh, kh, (((1,), (1,)), ((), ())),
                              preferred_element_type=jnp.float32)  # (Nq, Nk) f32

        # Numerically stable softmax: max-subtraction in f32, exp in compute dtype
        # (bf16 EUP on v6e/v7x), row-sum accumulated in f32.
        m = jnp.max(sim, axis=-1, keepdims=True)
        p = jnp.exp((sim - m).astype(cd))                          # (Nq, Nk) cd
        row_sum = jnp.sum(p.astype(jnp.float32), axis=-1, keepdims=True)
        inv = pl.reciprocal(row_sum, approx=True)                  # (Nq, 1) f32 (EUP)

        # Deferred normalization: normalize the (Nq, dh) output, not the (Nq, Nk) P.
        oh = jnp.dot(p, vh, preferred_element_type=jnp.float32)    # (Nq, dh) f32
        o_cat_ref[:, lo:lo + dim_head] = (oh * inv).astype(o_cat_ref.dtype)

    # Single wide-K output projection over the concatenated heads + bias.
    out = jnp.dot(o_cat_ref[...], wo_ref[...].astype(cd),
                  preferred_element_type=jnp.float32) + bo_ref[...]
    # Dropout(p=0.0) after the linear is identity.
    o_ref[0] = out.astype(o_ref.dtype)


def cross_attention(x, params, context=None, *, heads, dim_head,
                    compute_dtype=jnp.float32):
    """Pallas implementation of CrossAttention.forward (the module forces mask=None).

    Use compute_dtype=jnp.bfloat16 on v6e/v7x for bf16 MXU/EUP throughput
    (f32 accumulation is kept everywhere).
    """
    context = x if context is None else context
    B, Nq, Dq = x.shape
    _, Nk, Dc = context.shape
    inner = heads * dim_head
    scale = dim_head ** (-0.5)

    wq = params["wq"]                   # (Dq, inner)
    wk = params["wk"]                   # (Dc, inner)
    wv = params["wv"]                   # (Dc, inner)
    wo = params["wo"]                   # (inner, Dq)
    bo = params["bo"].reshape(1, Dq)

    kernel = functools.partial(
        _fused_cross_attn_kernel,
        heads=heads, dim_head=dim_head, scale=scale, compute_dtype=compute_dtype)

    return pl.pallas_call(
        kernel,
        out_shape=jax.ShapeDtypeStruct((B, Nq, Dq), jnp.float32),
        grid=(B,),
        in_specs=[
            pl.BlockSpec((1, Nq, Dq), lambda b: (b, 0, 0)),        # x
            pl.BlockSpec((1, Nk, Dc), lambda b: (b, 0, 0)),        # context
            pl.BlockSpec((Dq, inner), lambda b: (0, 0)),           # Wq (grid-invariant)
            pl.BlockSpec((Dc, inner), lambda b: (0, 0)),           # Wk
            pl.BlockSpec((Dc, inner), lambda b: (0, 0)),           # Wv
            pl.BlockSpec((inner, Dq), lambda b: (0, 0)),           # Wo
            pl.BlockSpec((1, Dq), lambda b: (0, 0)),               # bias
        ],
        out_specs=pl.BlockSpec((1, Nq, Dq), lambda b: (b, 0, 0)),
        scratch_shapes=[pltpu.VMEM((Nq, inner), compute_dtype)],   # head-concat slab
        compiler_params=pltpu.CompilerParams(
            dimension_semantics=("parallel",)),                    # batch across TCs (v7x)
    )(x, context, wq, wk, wv, wo, bo)


def reference_forward(x, params, context=None, *, heads, dim_head):
    """Pure-JAX reference mirroring the PyTorch module."""
    context = x if context is None else context
    B, Nq, _ = x.shape
    Nk = context.shape[1]
    H, dh = heads, dim_head
    q = x @ params["wq"]
    k = context @ params["wk"]
    v = context @ params["wv"]
    q = q.reshape(B, Nq, H, dh).transpose(0, 2, 1, 3)
    k = k.reshape(B, Nk, H, dh).transpose(0, 2, 1, 3)
    v = v.reshape(B, Nk, H, dh).transpose(0, 2, 1, 3)
    sim = jnp.einsum('bhid,bhjd->bhij', q, k) * dh ** (-0.5)
    attn = jax.nn.softmax(sim, axis=-1)
    o = jnp.einsum('bhij,bhjd->bhid', attn, v)
    o = o.transpose(0, 2, 1, 3).reshape(B, Nq, H * dh)
    return o @ params["wo"] + params["bo"]


def init_params(key, query_dim, context_dim, heads, dim_head):
    inner = heads * dim_head
    k1, k2, k3, k4, k5 = jax.random.split(key, 5)
    # Deterministic synthetic weights (stored transposed vs. PyTorch: y = x @ W).
    return {
        "wq": jax.random.normal(k1, (query_dim, inner), jnp.float32) * 0.1,
        "wk": jax.random.normal(k2, (context_dim, inner), jnp.float32) * 0.1,
        "wv": jax.random.normal(k3, (context_dim, inner), jnp.float32) * 0.1,
        "wo": jax.random.normal(k4, (inner, query_dim), jnp.float32) * 0.1,
        "bo": jax.random.normal(k5, (query_dim,), jnp.float32) * 0.1,
    }


if __name__ == "__main__":
    B, N, QUERY_DIM = 2, 8, 32
    HEADS, DIM_HEAD = 4, 16          # inner_dim = 64
    key = jax.random.PRNGKey(0)
    kx, kp = jax.random.split(key)

    x = jax.random.normal(kx, (B, N, QUERY_DIM), jnp.float32)
    params = init_params(kp, QUERY_DIM, QUERY_DIM, HEADS, DIM_HEAD)

    ref = reference_forward(x, params, context=None, heads=HEADS, dim_head=DIM_HEAD)

    # f32 path (reference-accurate; approx reciprocal only, rel err ~2^-12).
    out = cross_attention(x, params, context=None, heads=HEADS, dim_head=DIM_HEAD)
    out = jax.block_until_ready(out)
    assert out.shape == (B, N, QUERY_DIM)
    assert jnp.allclose(out, ref, atol=1e-2, rtol=1e-2), "f32 path mismatch vs reference"

    # bf16-on-MXU path (v6e/v7x): bf16 operands for ALL matmuls incl. QK^T, bf16 exp,
    # f32 accumulation / max / row-sum -> looser tolerance.
    out_bf16 = cross_attention(x, params, context=None, heads=HEADS, dim_head=DIM_HEAD,
                               compute_dtype=jnp.bfloat16)
    out_bf16 = jax.block_until_ready(out_bf16)
    assert jnp.allclose(out_bf16, ref, atol=1e-1, rtol=1e-1), "bf16 path mismatch vs reference"

    print("KERNEL_OK")
</pallas_src>

<mosaic_0001>
module attributes {stable_mosaic.version = 11 : i64} {
  func.func @_fused_cross_attn_kernel(%arg0: i32, %arg1: memref<1x8x32xf32, #tpu.memory_space<vmem>>, %arg2: memref<1x8x32xf32, #tpu.memory_space<vmem>>, %arg3: memref<32x64xf32, #tpu.memory_space<vmem>>, %arg4: memref<32x64xf32, #tpu.memory_space<vmem>>, %arg5: memref<32x64xf32, #tpu.memory_space<vmem>>, %arg6: memref<64x32xf32, #tpu.memory_space<vmem>>, %arg7: memref<1x32xf32, #tpu.memory_space<vmem>>, %arg8: memref<1x8x32xf32, #tpu.memory_space<vmem>>, %arg9: memref<8x64xf32, #tpu.memory_space<vmem>>) attributes {dimension_semantics = [#tpu.dimension_semantics<parallel>], iteration_bounds = array<i64: 2>, scalar_prefetch = 0 : i64, scratch_operands = 1 : i64, tpu.core_type = #tpu.core_type<tc>, window_params = [{transform_indices = @transform_0, window_bounds = array<i64: 1, 8, 32>}, {transform_indices = @transform_1, window_bounds = array<i64: 1, 8, 32>}, {pipeline_mode = #tpu.pipeline_mode<synchronous>, transform_indices = @transform_2, window_bounds = array<i64: 32, 64>}, {pipeline_mode = #tpu.pipeline_mode<synchronous>, transform_indices = @transform_3, window_bounds = array<i64: 32, 64>}, {pipeline_mode = #tpu.pipeline_mode<synchronous>, transform_indices = @transform_4, window_bounds = array<i64: 32, 64>}, {pipeline_mode = #tpu.pipeline_mode<synchronous>, transform_indices = @transform_5, window_bounds = array<i64: 64, 32>}, {pipeline_mode = #tpu.pipeline_mode<synchronous>, transform_indices = @transform_6, window_bounds = array<i64: 1, 32>}, {transform_indices = @transform_7, window_bounds = array<i64: 1, 8, 32>}]} {
    %c0 = arith.constant 0 : index
    %c0_0 = arith.constant 0 : index
    %c0_1 = arith.constant 0 : index
    %0 = vector.load %arg1[%c0, %c0_0, %c0_1] : memref<1x8x32xf32, #tpu.memory_space<vmem>>, vector<1x8x32xf32>
    %1 = vector.shape_cast %0 : vector<1x8x32xf32> to vector<8x32xf32>
    %c0_2 = arith.constant 0 : index
    %c0_3 = arith.constant 0 : index
    %c0_4 = arith.constant 0 : index
    %2 = vector.load %arg2[%c0_2, %c0_3, %c0_4] : memref<1x8x32xf32, #tpu.memory_space<vmem>>, vector<1x8x32xf32>
    %3 = vector.shape_cast %2 : vector<1x8x32xf32> to vector<8x32xf32>
    %c0_5 = arith.constant 0 : index
    %c0_6 = arith.constant 0 : index
    %4 = vector.load %arg3[%c0_5, %c0_6] : memref<32x64xf32, #tpu.memory_space<vmem>>, vector<32x64xf32>
    %cst = arith.constant dense<0.000000e+00> : vector<8x64xf32>
    %5 = tpu.matmul %1, %4, %cst {dimension_numbers = #tpu.dot_dimension_numbers<[1], [0], [0], [1], [0, 0, 1, 1], [], []>} : vector<8x32xf32>, vector<32x64xf32>, vector<8x64xf32> -> vector<8x64xf32>
    %cst_7 = arith.constant 2.500000e-01 : f32
    %6 = vector.broadcast %cst_7 : f32 to vector<8x64xf32>
    %7 = arith.mulf %5, %6 : vector<8x64xf32>
    %c0_8 = arith.constant 0 : index
    %c0_9 = arith.constant 0 : index
    %8 = vector.load %arg4[%c0_8, %c0_9] : memref<32x64xf32, #tpu.memory_space<vmem>>, vector<32x64xf32>
    %cst_10 = arith.constant dense<0.000000e+00> : vector<8x64xf32>
    %9 = tpu.matmul %3, %8, %cst_10 {dimension_numbers = #tpu.dot_dimension_numbers<[1], [0], [0], [1], [0, 0, 1, 1], [], []>} : vector<8x32xf32>, vector<32x64xf32>, vector<8x64xf32> -> vector<8x64xf32>
    %c0_11 = arith.constant 0 : index
    %c0_12 = arith.constant 0 : index
    %10 = vector.load %arg5[%c0_11, %c0_12] : memref<32x64xf32, #tpu.memory_space<vmem>>, vector<32x64xf32>
    %cst_13 = arith.constant dense<0.000000e+00> : vector<8x64xf32>
    %11 = tpu.matmul %3, %10, %cst_13 {dimension_numbers = #tpu.dot_dimension_numbers<[1], [0], [0], [1], [0, 0, 1, 1], [], []>} : vector<8x32xf32>, vector<32x64xf32>, vector<8x64xf32> -> vector<8x64xf32>
    %12 = vector.extract_strided_slice %7 {offsets = [0, 0], sizes = [8, 16], strides = [1, 1]} : vector<8x64xf32> to vector<8x16xf32>
    %13 = vector.extract_strided_slice %9 {offsets = [0, 0], sizes = [8, 16], strides = [1, 1]} : vector<8x64xf32> to vector<8x16xf32>
    %14 = vector.extract_strided_slice %11 {offsets = [0, 0], sizes = [8, 16], strides = [1, 1]} : vector<8x64xf32> to vector<8x16xf32>
    %cst_14 = arith.constant dense<0.000000e+00> : vector<8x8xf32>
    %15 = tpu.matmul %12, %13, %cst_14 {dimension_numbers = #tpu.dot_dimension_numbers<[1], [1], [0], [0], [0, 0, 1, 0], [], []>} : vector<8x16xf32>, vector<8x16xf32>, vector<8x8xf32> -> vector<8x8xf32>
    %cst_15 = arith.constant dense<0xFF800000> : vector<8xf32>
    %16 = vector.multi_reduction <maximumf>, %15, %cst_15 [1] : vector<8x8xf32> to vector<8xf32>
    %17 = vector.shape_cast %16 : vector<8xf32> to vector<8x1xf32>
    %18 = vector.broadcast %17 : vector<8x1xf32> to vector<8x8xf32>
    %19 = arith.subf %15, %18 : vector<8x8xf32>
    %20 = math.exp %19 : vector<8x8xf32>
    %cst_16 = arith.constant dense<0.000000e+00> : vector<8xf32>
    %21 = vector.multi_reduction <add>, %20, %cst_16 [1] : vector<8x8xf32> to vector<8xf32>
    %22 = vector.shape_cast %21 : vector<8xf32> to vector<8x1xf32>
    %23 = tpu.reciprocal %22 {approx = true} : vector<8x1xf32> -> vector<8x1xf32>
    %cst_17 = arith.constant dense<0.000000e+00> : vector<8x16xf32>
    %24 = tpu.matmul %20, %14, %cst_17 {dimension_numbers = #tpu.dot_dimension_numbers<[1], [0], [0], [1], [0, 0, 1, 1], [], []>} : vector<8x8xf32>, vector<8x16xf32>, vector<8x16xf32> -> vector<8x16xf32>
    %25 = vector.broadcast %23 : vector<8x1xf32> to vector<8x16xf32>
    %26 = arith.mulf %24, %25 : vector<8x16xf32>
    %c0_18 = arith.constant 0 : index
    %c0_19 = arith.constant 0 : index
    %27 = vector.load %arg9[%c0_18, %c0_19] : memref<8x64xf32, #tpu.memory_space<vmem>>, vector<8x16xf32>
    tpu.vector_store %arg9[%c0_18, %c0_19], %26 {strides = array<i32>} : memref<8x64xf32, #tpu.memory_space<vmem>>, vector<8x16xf32>,
    %28 = vector.extract_strided_slice %7 {offsets = [0, 16], sizes = [8, 16], strides = [1, 1]} : vector<8x64xf32> to vector<8x16xf32>
    %29 = vector.extract_strided_slice %9 {offsets = [0, 16], sizes = [8, 16], strides = [1, 1]} : vector<8x64xf32> to vector<8x16xf32>
    %30 = vector.extract_strided_slice %11 {offsets = [0, 16], sizes = [8, 16], strides = [1, 1]} : vector<8x64xf32> to vector<8x16xf32>
    %cst_20 = arith.constant dense<0.000000e+00> : vector<8x8xf32>
    %31 = tpu.matmul %28, %29, %cst_20 {dimension_numbers = #tpu.dot_dimension_numbers<[1], [1], [0], [0], [0, 0, 1, 0], [], []>} : vector<8x16xf32>, vector<8x16xf32>, vector<8x8xf32> -> vector<8x8xf32>
    %cst_21 = arith.constant dense<0xFF800000> : vector<8xf32>
    %32 = vector.multi_reduction <maximumf>, %31, %cst_21 [1] : vector<8x8xf32> to vector<8xf32>
    %33 = vector.shape_cast %32 : vector<8xf32> to vector<8x1xf32>
    %34 = vector.broadcast %33 : vector<8x1xf32> to vector<8x8xf32>
    %35 = arith.subf %31, %34 : vector<8x8xf32>
    %36 = math.exp %35 : vector<8x8xf32>
    %cst_22 = arith.constant dense<0.000000e+00> : vector<8xf32>
    %37 = vector.multi_reduction <add>, %36, %cst_22 [1] : vector<8x8xf32> to vector<8xf32>
    %38 = vector.shape_cast %37 : vector<8xf32> to vector<8x1xf32>
    %39 = tpu.reciprocal %38 {approx = true} : vector<8x1xf32> -> vector<8x1xf32>
    %cst_23 = arith.constant dense<0.000000e+00> : vector<8x16xf32>
    %40 = tpu.matmul %36, %30, %cst_23 {dimension_numbers = #tpu.dot_dimension_numbers<[1], [0], [0], [1], [0, 0, 1, 1], [], []>} : vector<8x8xf32>, vector<8x16xf32>, vector<8x16xf32> -> vector<8x16xf32>
    %41 = vector.broadcast %39 : vector<8x1xf32> to vector<8x16xf32>
    %42 = arith.mulf %40, %41 : vector<8x16xf32>
    %c0_24 = arith.constant 0 : index
    %c16 = arith.constant 16 : index
    %43 = vector.load %arg9[%c0_24, %c16] : memref<8x64xf32, #tpu.memory_space<vmem>>, vector<8x16xf32>
    tpu.vector_store %arg9[%c0_24, %c16], %42 {strides = array<i32>} : memref<8x64xf32, #tpu.memory_space<vmem>>, vector<8x16xf32>,
    %44 = vector.extract_strided_slice %7 {offsets = [0, 32], sizes = [8, 16], strides = [1, 1]} : vector<8x64xf32> to vector<8x16xf32>
    %45 = vector.extract_strided_slice %9 {offsets = [0, 32], sizes = [8, 16], strides = [1, 1]} : vector<8x64xf32> to vector<8x16xf32>
    %46 = vector.extract_strided_slice %11 {offsets = [0, 32], sizes = [8, 16], strides = [1, 1]} : vector<8x64xf32> to vector<8x16xf32>
    %cst_25 = arith.constant dense<0.000000e+00> : vector<8x8xf32>
    %47 = tpu.matmul %44, %45, %cst_25 {dimension_numbers = #tpu.dot_dimension_numbers<[1], [1], [0], [0], [0, 0, 1, 0], [], []>} : vector<8x16xf32>, vector<8x16xf32>, vector<8x8xf32> -> vector<8x8xf32>
    %cst_26 = arith.constant dense<0xFF800000> : vector<8xf32>
    %48 = vector.multi_reduction <maximumf>, %47, %cst_26 [1] : vector<8x8xf32> to vector<8xf32>
    %49 = vector.shape_cast %48 : vector<8xf32> to vector<8x1xf32>
    %50 = vector.broadcast %49 : vector<8x1xf32> to vector<8x8xf32>
    %51 = arith.subf %47, %50 : vector<8x8xf32>
    %52 = math.exp %51 : vector<8x8xf32>
    %cst_27 = arith.constant dense<0.000000e+00> : vector<8xf32>
    %53 = vector.multi_reduction <add>, %52, %cst_27 [1] : vector<8x8xf32> to vector<8xf32>
    %54 = vector.shape_cast %53 : vector<8xf32> to vector<8x1xf32>
    %55 = tpu.reciprocal %54 {approx = true} : vector<8x1xf32> -> vector<8x1xf32>
    %cst_28 = arith.constant dense<0.000000e+00> : vector<8x16xf32>
    %56 = tpu.matmul %52, %46, %cst_28 {dimension_numbers = #tpu.dot_dimension_numbers<[1], [0], [0], [1], [0, 0, 1, 1], [], []>} : vector<8x8xf32>, vector<8x16xf32>, vector<8x16xf32> -> vector<8x16xf32>
    %57 = vector.broadcast %55 : vector<8x1xf32> to vector<8x16xf32>
    %58 = arith.mulf %56, %57 : vector<8x16xf32>
    %c0_29 = arith.constant 0 : index
    %c32 = arith.constant 32 : index
    %59 = vector.load %arg9[%c0_29, %c32] : memref<8x64xf32, #tpu.memory_space<vmem>>, vector<8x16xf32>
    tpu.vector_store %arg9[%c0_29, %c32], %58 {strides = array<i32>} : memref<8x64xf32, #tpu.memory_space<vmem>>, vector<8x16xf32>,
    %60 = vector.extract_strided_slice %7 {offsets = [0, 48], sizes = [8, 16], strides = [1, 1]} : vector<8x64xf32> to vector<8x16xf32>
    %61 = vector.extract_strided_slice %9 {offsets = [0, 48], sizes = [8, 16], strides = [1, 1]} : vector<8x64xf32> to vector<8x16xf32>
    %62 = vector.extract_strided_slice %11 {offsets = [0, 48], sizes = [8, 16], strides = [1, 1]} : vector<8x64xf32> to vector<8x16xf32>
    %cst_30 = arith.constant dense<0.000000e+00> : vector<8x8xf32>
    %63 = tpu.matmul %60, %61, %cst_30 {dimension_numbers = #tpu.dot_dimension_numbers<[1], [1], [0], [0], [0, 0, 1, 0], [], []>} : vector<8x16xf32>, vector<8x16xf32>, vector<8x8xf32> -> vector<8x8xf32>
    %cst_31 = arith.constant dense<0xFF800000> : vector<8xf32>
    %64 = vector.multi_reduction <maximumf>, %63, %cst_31 [1] : vector<8x8xf32> to vector<8xf32>
    %65 = vector.shape_cast %64 : vector<8xf32> to vector<8x1xf32>
    %66 = vector.broadcast %65 : vector<8x1xf32> to vector<8x8xf32>
    %67 = arith.subf %63, %66 : vector<8x8xf32>
    %68 = math.exp %67 : vector<8x8xf32>
    %cst_32 = arith.constant dense<0.000000e+00> : vector<8xf32>
    %69 = vector.multi_reduction <add>, %68, %cst_32 [1] : vector<8x8xf32> to vector<8xf32>
    %70 = vector.shape_cast %69 : vector<8xf32> to vector<8x1xf32>
    %71 = tpu.reciprocal %70 {approx = true} : vector<8x1xf32> -> vector<8x1xf32>
    %cst_33 = arith.constant dense<0.000000e+00> : vector<8x16xf32>
    %72 = tpu.matmul %68, %62, %cst_33 {dimension_numbers = #tpu.dot_dimension_numbers<[1], [0], [0], [1], [0, 0, 1, 1], [], []>} : vector<8x8xf32>, vector<8x16xf32>, vector<8x16xf32> -> vector<8x16xf32>
    %73 = vector.broadcast %71 : vector<8x1xf32> to vector<8x16xf32>
    %74 = arith.mulf %72, %73 : vector<8x16xf32>
    %c0_34 = arith.constant 0 : index
    %c48 = arith.constant 48 : index
    %75 = vector.load %arg9[%c0_34, %c48] : memref<8x64xf32, #tpu.memory_space<vmem>>, vector<8x16xf32>
    tpu.vector_store %arg9[%c0_34, %c48], %74 {strides = array<i32>} : memref<8x64xf32, #tpu.memory_space<vmem>>, vector<8x16xf32>,
    %c0_35 = arith.constant 0 : index
    %c0_36 = arith.constant 0 : index
    %76 = vector.load %arg9[%c0_35, %c0_36] : memref<8x64xf32, #tpu.memory_space<vmem>>, vector<8x64xf32>
    %c0_37 = arith.constant 0 : index
    %c0_38 = arith.constant 0 : index
    %77 = vector.load %arg6[%c0_37, %c0_38] : memref<64x32xf32, #tpu.memory_space<vmem>>, vector<64x32xf32>
    %cst_39 = arith.constant dense<0.000000e+00> : vector<8x32xf32>
    %78 = tpu.matmul %76, %77, %cst_39 {dimension_numbers = #tpu.dot_dimension_numbers<[1], [0], [0], [1], [0, 0, 1, 1], [], []>} : vector<8x64xf32>, vector<64x32xf32>, vector<8x32xf32> -> vector<8x32xf32>
    %c0_40 = arith.constant 0 : index
    %c0_41 = arith.constant 0 : index
    %79 = vector.load %arg7[%c0_40, %c0_41] : memref<1x32xf32, #tpu.memory_space<vmem>>, vector<1x32xf32>
    %80 = vector.broadcast %79 : vector<1x32xf32> to vector<8x32xf32>
    %81 = arith.addf %78, %80 : vector<8x32xf32>
    %c0_42 = arith.constant 0 : index
    %c0_43 = arith.constant 0 : index
    %c0_44 = arith.constant 0 : index
    %82 = vector.load %arg8[%c0_42, %c0_43, %c0_44] : memref<1x8x32xf32, #tpu.memory_space<vmem>>, vector<1x8x32xf32>
    %83 = vector.shape_cast %82 : vector<1x8x32xf32> to vector<8x32xf32>
    %84 = vector.shape_cast %81 : vector<8x32xf32> to vector<1x8x32xf32>
    tpu.vector_store %arg8[%c0_42, %c0_43, %c0_44], %84 {strides = array<i32>} : memref<1x8x32xf32, #tpu.memory_space<vmem>>, vector<1x8x32xf32>,
    return
  }
  func.func @transform_0(%arg0: i32) -> (i32, i32, i32) {
    %c0_i32 = arith.constant 0 : i32
    %c0_i32_0 = arith.constant 0 : i32
    %c0_i32_1 = arith.constant 0 : i32
    return %arg0, %c0_i32, %c0_i32_0 : i32, i32, i32
  }
  func.func @transform_1(%arg0: i32) -> (i32, i32, i32) {
    %c0_i32 = arith.constant 0 : i32
    %c0_i32_0 = arith.constant 0 : i32
    %c0_i32_1 = arith.constant 0 : i32
    return %arg0, %c0_i32, %c0_i32_0 : i32, i32, i32
  }
  func.func @transform_2(%arg0: i32) -> (i32, i32) {
    %c0_i32 = arith.constant 0 : i32
    %c0_i32_0 = arith.constant 0 : i32
    %c0_i32_1 = arith.constant 0 : i32
    return %c0_i32, %c0_i32_0 : i32, i32
  }
  func.func @transform_3(%arg0: i32) -> (i32, i32) {
    %c0_i32 = arith.constant 0 : i32
    %c0_i32_0 = arith.constant 0 : i32
    %c0_i32_1 = arith.constant 0 : i32
    return %c0_i32, %c0_i32_0 : i32, i32
  }
  func.func @transform_4(%arg0: i32) -> (i32, i32) {
    %c0_i32 = arith.constant 0 : i32
    %c0_i32_0 = arith.constant 0 : i32
    %c0_i32_1 = arith.constant 0 : i32
    return %c0_i32, %c0_i32_0 : i32, i32
  }
  func.func @transform_5(%arg0: i32) -> (i32, i32) {
    %c0_i32 = arith.constant 0 : i32
    %c0_i32_0 = arith.constant 0 : i32
    %c0_i32_1 = arith.constant 0 : i32
    return %c0_i32, %c0_i32_0 : i32, i32
  }
  func.func @transform_6(%arg0: i32) -> (i32, i32) {
    %c0_i32 = arith.constant 0 : i32
    %c0_i32_0 = arith.constant 0 : i32
    %c0_i32_1 = arith.constant 0 : i32
    return %c0_i32, %c0_i32_0 : i32, i32
  }
  func.func @transform_7(%arg0: i32) -> (i32, i32, i32) {
    %c0_i32 = arith.constant 0 : i32
    %c0_i32_0 = arith.constant 0 : i32
    %c0_i32_1 = arith.constant 0 : i32
    return %arg0, %c0_i32, %c0_i32_0 : i32, i32, i32
  }
}

</mosaic_0001>

<bundles_post_ra>
// kernel: tpu_custom_call.1
= control target key start
LH: loop header
LB: loop body
LE: loop exit
PB: predicated region body
PF: predicated region fallthrough
CT: control target
= control target key end

     0   :  { %s2210_s0 = inlined_call_operand.hbm [shape: f32[2,8,32], index: 0, kind: input, shape index: {}]   ;;  %s2211_s1 = inlined_call_operand.hbm [shape: f32[2,8,32], index: 1, kind: input, shape index: {}]   ;;  %s2212_s2 = inlined_call_operand.vmem [shape: f32[32,64], index: 2, kind: input, shape index: {}]   ;;  %s2213_s3 = inlined_call_operand.vmem [shape: f32[32,64], index: 3, kind: input, shape index: {}]   ;;  %s2214_s4 = inlined_call_operand.vmem [shape: f32[32,64], index: 4, kind: input, shape index: {}]   ;;  %s2215_s5 = inlined_call_operand.vmem [shape: f32[64,32], index: 5, kind: input, shape index: {}]   ;;  %s2216_s6 = inlined_call_operand.vmem [shape: f32[1,32], index: 6, kind: input, shape index: {}]   ;;  %s2217_s7 = inlined_call_operand.hbm [shape: f32[2,8,32], index: 7, kind: output, shape index: {}]  }
   0x1   :  { %2222 = sst [smem:[#allocation12_spill]] %s2210_s0 }
   0x2   :  { %12 = vsyncpa [#allocation4], 0 }
   0x3   :  { %14 = vsyncpa [#allocation4 + $0x1], 0 }
   0x4   :  { %15 = vsyncpa [#allocation7], 0 }
   0x5   :  { %17 = vsyncpa [#allocation7 + $0x1], 0 }
   0x6   :  { %18 = vsyncpa [#allocation5], 0 }
   0x7   :  { %20 = vsyncpa [#allocation5 + $0x1], 0  ;;  %s1854_s24 = smov 0   ;;  %s1856_s25 = smov 0  }
   0x8   :  { %s1858_s26 = smov 0   ;;  %s1860_s27 = smov 0  }
   0x9 LB: > { %s1875_s28 = sadd.s32 4294967295, %s1801_s27   ;;  %s1438_s29 = sadd.s32 4294967294, %s1801_s27   ;;  %s1801_s27 = sphi %s1860_s27, %s2242_s27   ;;  %s1797_s26 = sphi %s1858_s26, %s2241_s26   ;;  %s1793_s25 = sphi %s1856_s25, %s2240_s25   ;;  %s1789_s24 = sphi %s1854_s24, %s2239_s24  }
   0xa   : > { %s1879_s30 = sadd.s32 1, %s1801_s27   ;;  %s33_s8 = sadd.s32 1, %s1797_s26 }
   0xb   : > { %s30_s9 = ssub.s32 %s1801_s27, %s1879_s30  ;;  %p40_p0 = scmp.ne.s32.totalorder %s1797_s26, %s1793_s25 }
   0xc   : > { %p31_p1 = scmp.eq.s32.totalorder %s30_s9, 0  ;;  %p41_p2 = scmp.eq.s32.totalorder %s1801_s27, 0 }
   0xd   : > { %p46_p3 = scmp.ne.s32.totalorder %s1793_s25, %s1789_s24  ;;  %p47_p4 = scmp.eq.s32.totalorder %s1875_s28, 0 }
   0xe   : > { %s1891_s10 = scalar_select %p31_p1, %s1797_s26, %s33_s8  }
   0xf   : > { %p1893_p5 = por %p41_p2, %p40_p0  ;;  %p1897_p6 = por %p47_p4, %p46_p3 }
  0x10   : > { %p201_p7 = scmp.eq.s32.totalorder %s1875_s28, 1  ;;  %p207_p8 = scmp.eq.s32.totalorder %s1438_s29, 1 }
  0x11   : > { %s2224_s12 = scalar_select %p1897_p6, 1, 0 }
  0x12   : > { %p1619_p10 = scmp.lt.s32.totalorder %s1801_s27, 2  ;;  %p1904_p11 = por %p201_p7, %p40_p0 }
  0x13   : > { %p1908_p12 = por %p207_p8, %p46_p3  ;;  %s1913_s15 = sand.u32 1, %s1797_s26  }
  0x14   : > { %s2225_s13 = scalar_select %p1904_p11, 1, 0 }
  0x15   : > { %s2226_s14 = scalar_select %p1908_p12, 1, 0 }
  0x16   : > { %s2219_s16 = sshll.u32 %s1801_s27, 7  ;;  %s2218_s17 = sshll.u32 %s1913_s15, 3 }
  0x17   : > { %s2227_s0 = sld [smem:[#allocation12_spill]]  ;;  %s246_s21 = scalar_lea.vmem [#allocation3], %s2218_s17 }
  0x18   : > { %s253_s22 = sshll.u32 %s246_s21, 4  ;;  %p1928_p13 = pnand %p1619_p10, %p1893_p5  ;;  %s1932_s22 = int_to_ptr.vmem [resolvable:$true] %s253_s22 }
  0x19   : > { %s243_s29 = scalar_lea.sflag [#allocation4], %s1913_s15 }
  0x1a   : > { %p1679_p3 = pneg %p1928_p13 }
  0x1d   : > { %s1922_s20 = scalar_lea.hbm %s2227_s0, %s2219_s16  ;;  %s1682_s18 = scalar_lea.hbm %s2227_s0, 256 }
  0x1e   : > { %s1677_s8 = scalar_lea.hbm %s1922_s20, 128  ;;  %p1683_p5 = scmp.lt.s32.totalorder %s1922_s20, %s2227_s0 }
  0x1f   : > { %p1678_p2 = scmp.ne.s32.totalorder %s1922_s20, %s1677_s8  ;;  %p1684_p8 = scmp.lt.s32.totalorder %s1682_s18, %s1677_s8 }
  0x21   : > { %p1680_p4 = pnand %p1679_p3, %p1678_p2  ;;  %p1685_p10 = por %p1684_p8, %p1683_p5 }
  0x23   : > { %p1681_p7 = pneg %p1680_p4 }
  0x25   : > { %p1686_p9 = pnand %p1685_p10, %p1681_p7 }
  0x27   : > { %1689 = shalt.err (!%p1686_p9)
}
  0x28   : > { %s1690_s17 = scalar_lea.vmem %s1932_s22, 128  ;;  %s1803_s9 = smov [#allocation3]  }
  0x29   : > { %p1691_p0 = scmp.ne.s32.totalorder %s1932_s22, %s1690_s17  ;;  %s1695_s11 = sshll.u32 %s1803_s9, 4  ;;  %s1696_s11 = int_to_ptr.vmem [resolvable:$false] %s1695_s11 }
  0x2a   : > { %s1697_s16 = scalar_lea.vmem %s1696_s11, 256  ;;  %p1698_p1 = scmp.lt.s32.totalorder %s1932_s22, %s1696_s11 }
  0x2b   : > { %p1693_p2 = pnand %p1691_p0, %p1679_p3  ;;  %p1699_p12 = scmp.lt.s32.totalorder %s1697_s16, %s1690_s17 }
  0x2d   : > { %p1694_p4 = pneg %p1693_p2  ;;  %p1700_p11 = por %p1699_p12, %p1698_p1 }
  0x2f   : > { %p1701_p5 = pnand %p1700_p11, %p1694_p4 }
  0x31   : > { %1704 = shalt.err (!%p1701_p5)
}
  0x32   : > { %1611 = dma.hbm_to_vmem [thread:$0]  (!%p1928_p13), %s1922_s20, 128, %s1932_s22, %s243_s29  }
  0x33   : > { %p2229_p9 = scmp.lt.s32.totalorder %s1801_s27, 3  ;;  %p2230_p0 = scmp.ge.s32.totalorder %s1801_s27, 1 }
  0x34   : > { %s2232_s16 = sshll.u32 %s1801_s27, 7  ;;  %s2233_s21 = sshll.u32 %s1913_s15, 3 }
  0x35   : > { %p1965_p7 = pnand %p2230_p0, %p2229_p9  ;;  %s1974_s19 = scalar_lea.hbm %s2211_s1, %s2232_s16 }
  0x36   : > { %s264_s9 = scalar_lea.vmem [#allocation6], %s2233_s21  ;;  %s261_s20 = scalar_lea.sflag [#allocation7], %s1913_s15 }
  0x37   : > { %s2231_s8 = scalar_select %p1965_p7, 1, 0 }
  0x38   : > { %s271_s11 = sshll.u32 %s264_s9, 4  ;;  %s1705_s22 = scalar_lea.hbm %s1974_s19, 128  ;;  %s272_s11 = int_to_ptr.vmem [resolvable:$true] %s271_s11 }
  0x39   : > { %p1706_p11 = scmp.ne.s32.totalorder %s1974_s19, %s1705_s22  ;;  %s1710_s17 = scalar_lea.hbm %s2211_s1, 256 }
  0x3a   : > { %p1711_p8 = scmp.lt.s32.totalorder %s1974_s19, %s2211_s1  ;;  %p1712_p10 = scmp.lt.s32.totalorder %s1710_s17, %s1705_s22 }
  0x3b   : > { %p1708_p12 = pnand %p1706_p11, %p1679_p3 }
  0x3c   : > { %p1713_p2 = por %p1712_p10, %p1711_p8 }
  0x3d   : > { %p1709_p1 = pneg %p1708_p12 }
  0x3f   : > { %p1714_p4 = pnand %p1713_p2, %p1709_p1 }
  0x41   : > { %1717 = shalt.err (!%p1714_p4)
}
  0x42   : > { %s1718_s21 = scalar_lea.vmem %s272_s11, 128  ;;  %s1804_s15 = smov [#allocation6]  }
  0x43   : > { %p1719_p5 = scmp.ne.s32.totalorder %s272_s11, %s1718_s21  ;;  %s1723_s9 = sshll.u32 %s1804_s15, 4  ;;  %s1724_s9 = int_to_ptr.vmem [resolvable:$false] %s1723_s9 }
  0x44   : > { %s1725_s0 = scalar_lea.vmem %s1724_s9, 256  ;;  %p1726_p11 = scmp.lt.s32.totalorder %s272_s11, %s1724_s9 }
  0x45   : > { %p1721_p9 = pnand %p1719_p5, %p1679_p3  ;;  %p1727_p12 = scmp.lt.s32.totalorder %s1725_s0, %s1718_s21 }
  0x47   : > { %p1722_p0 = pneg %p1721_p9  ;;  %p1728_p6 = por %p1727_p12, %p1726_p11 }
  0x49   : > { %p1729_p7 = pnand %p1728_p6, %p1722_p0 }
  0x4b   : > { %1732 = shalt.err (!%p1729_p7)
}
  0x4c   : > { %1614 = dma.hbm_to_vmem [thread:$0]  (!%p1928_p13), %s1974_s19, 128, %s272_s11, %s261_s20  }
  0x4d   : > { %p2234_p1 = scmp.ne.s32.totalorder %s2231_s8, 0 }
  0x4e   : > { %s2000_s22 = sand.u32 (!%p2234_p1), 1, %s1793_s25   ;;  %p2235_p6 = scmp.ne.s32.totalorder (!%p2234_p1), %s2224_s12, 0 }
  0x4f   : > { %280 = sbr.rel (%p2234_p1) target bundleno = 1302 (0x516), region = 48  ;;  %s2003_s29 = sshll.u32 (!%p2234_p1), %s2000_s22, 3 }
  0x50   : > { %s283_s17 = scalar_lea.sflag (!%p2234_p1), [#allocation4], %s2000_s22  ;;  %s286_s16 = scalar_lea.vmem (!%p2234_p1), [#allocation3], %s2003_s29 }
  0x54   : > { %1776 = dma.done.wait (%p2235_p6), %s283_s17, 128  }
  0x55   : > { %1778 = vsyncadd (%p2235_p6), %s283_s17, 4294967168  ;;  %s292_s23 = scalar_lea.sflag [#allocation7], %s2000_s22  ;;  %s295_s8 = scalar_lea.vmem [#allocation6], %s2003_s29 }
  0x56   : > { %1780 = dma.done.wait (%p2235_p6), %s292_s23, 128  }
  0x57   : > { %1782 = vsyncadd (%p2235_p6), %s292_s23, 4294967168  ;;  %v1805_v0 = vmov 0.0   ;;  %vm1806_vm0 = vmmov 0   ;;  %v336_v1 = vld [vmem:[%s2212_s2 + $0x18] sm:$0xff]  ;;  %v335_v2 = vld [vmem:[%s2212_s2 + $0x10] sm:$0xff]  ;;  %vm337_vm1 = vcmask 261120  }
  0x58   : > { %1510 = vmatprep.subr.mxu1 %v1805_v0  ;;  %1518 = vmatprep.mubr.msk.f32.mxu1 %vm1806_vm0, %v1805_v0  ;;  %v334_v3 = vld [vmem:[%s2212_s2 + $0x8] sm:$0xff]  ;;  %v333_v4 = vld [vmem:[%s2212_s2] sm:$0xff]  ;;  %v415_v6 = vld [vmem:[%s2213_s3 + $0x18] sm:$0xff]  ;;  %vm563_vm2 = vcmask 130048   ;;  %s1807_s19 = smov 96   ;;  %s1809_s11 = smov 80  }
  0x59   : > { %1532 = vmatprep.subr.mxu0 %v1805_v0  ;;  %1540 = vmatprep.mubr.msk.f32.mxu0 %vm1806_vm0, %v1805_v0  ;;  %v331_v5 = vld [vmem:[%s286_s16] sm:$0xff]  ;;  %v412_v9 = vld [vmem:[%s2213_s3] sm:$0xff]  ;;  %v492_v11 = vld [vmem:[%s2214_s4 + $0x18] sm:$0xff]  ;;  %s1808_s16 = smov 112   ;;  %vm640_vm3 = vcmask 64512   ;;  %s1810_s21 = smov 16  }
  0x5a   : > { %1511 = vmatpush3.msra.mxu1 %v336_v1  ;;  %v414_v7 = vld [vmem:[%s2213_s3 + $0x10] sm:$0xff]  ;;  %v413_v8 = vld [vmem:[%s2213_s3 + $0x8] sm:$0xff]  ;;  %v332_v10 = vld [vmem:[%s295_s8] sm:$0xff]  ;;  %1533 = vmatpush3.msra.mxu0 %v492_v11  ;;  %s1811_s15 = smov 32   ;;  %s1812_s9 = smov 48   ;;  %vm896_vm4 = vcmask 261248  }
  0x5b   : > { %1512 = vmatprep.subr.mxu1 %v1805_v0  ;;  %v491_v12 = vld [vmem:[%s2214_s4 + $0x10] sm:$0xff]  ;;  %1534 = vmatprep.subr.mxu0 %v1805_v0  ;;  %v490_v13 = vld [vmem:[%s2214_s4 + $0x8] sm:$0xff]  ;;  %v489_v14 = vld [vmem:[%s2214_s4] sm:$0xff]  ;;  %vm1067_vm5 = vcmask 392448   ;;  %vm1238_vm6 = vcmask 523648   ;;  %vm1256_vm7 = vcmask 523264  }
  0x5c   : > { %1513 = vmatpush3.msra.mxu1 %v335_v2  ;;  %1535 = vmatpush3.msra.mxu0 %v491_v12  ;;  %v1245_v11 = vld [vmem:[%s2215_s5 + $0x20] sm:$0xff]  ;;  %v1244_v12 = vld [vmem:[%s2215_s5 + $0x18] sm:$0xff]  ;;  %s1467_s17 = sshll.u32 %s1875_s28, 7  ;;  %s330_s23 = scalar_lea.vmem [#allocation8], %s2003_s29 }
  0x5d   : > { %1514 = vmatprep.subr.mxu1 %v1805_v0  ;;  %1536 = vmatprep.subr.mxu0 %v1805_v0  ;;  %s2172_s20 = scalar_lea.hbm %s2217_s7, %s1467_s17  ;;  %s1332_s18 = scalar_lea.sflag [#allocation5], %s2000_s22 }
  0x5e   : > { %1515 = vmatpush3.msra.mxu1 %v334_v3  ;;  %1537 = vmatpush3.msra.mxu0 %v490_v13  ;;  %v1243_v13 = vld [vmem:[%s2215_s5 + $0x10] sm:$0xff]  ;;  %p2236_p3 = scmp.ne.s32.totalorder %s2225_s13, 0  ;;  %s1813_s28 = smov [#allocation8]  }
  0x5f   : > { %1516 = vmatprep.subr.mxu1 %v1805_v0  ;;  %1538 = vmatprep.subr.mxu0 %v1805_v0  ;;  %s1737_s29 = sshll.u32 %s1813_s28, 4  ;;  %s1738_s29 = int_to_ptr.vmem [resolvable:$false] %s1737_s29 }
  0x60   : > { %1517 = vmatpush3.msra.mxu1 %v333_v4  ;;  %1539 = vmatpush3.msra.mxu0 %v489_v14 }
  0x61   : > { %1519 = vmatmul.mubr.msk.f32.vlgmr.msra.gmra.mxu1 %vm337_vm1, %v331_v5  ;;  %1521 = vmatprep.subr.mxu1 %v1805_v0 }
  0x62   : > { %1522 = vmatpush3.msra.mxu1 %v415_v6  ;;  %1529 = vmatprep.mubr.msk.f32.mxu1 %vm1806_vm0, %v1805_v0 }
  0x63   : > { %1523 = vmatprep.subr.mxu1 %v1805_v0  ;;  %1541 = vmatmul.mubr.msk.f32.vlgmr.msra.gmra.mxu0 %vm337_vm1, %v332_v10 }
  0x64   : > { %1524 = vmatpush3.msra.mxu1 %v414_v7  ;;  %1553 = vmatprep.subr.mxu0 %v1805_v0  ;;  %v1248_v7 = vld [vmem:[%s2215_s5 + $0x38] sm:$0xff] }
  0x65   : > { %1525 = vmatprep.subr.mxu1 %v1805_v0  ;;  %1555 = vmatprep.mubr.msk.f32.mxu0 %vm1806_vm0, %v1805_v0 }
  0x66   : > { %1526 = vmatpush3.msra.mxu1 %v413_v8  ;;  %v1247_v8 = vld [vmem:[%s2215_s5 + $0x30] sm:$0xff] }
  0x67   : > { %1527 = vmatprep.subr.mxu1 %v1805_v0 }
  0x68   : > { %1528 = vmatpush3.msra.mxu1 %v412_v9 }
  0x69   : > { %1530 = vmatmul.mubr.msk.f32.vlgmr.msra.gmra.mxu1 %vm337_vm1, %v332_v10  ;;  %1543 = vmatprep.subr.mxu1 %v1805_v0  ;;  %v1246_v10 = vld [vmem:[%s2215_s5 + $0x28] sm:$0xff] }
  0x6a   : > { %1545 = vmatprep.mubr.msk.f32.mxu1 %vm1806_vm0, %v1805_v0 }
 0x121   : > { %v407_v15 = vpop.f32.mrf.mxu1 }
 0x122   : > { %v411_v19 = vmul.f32 0.25, %v407_v15 }
 0x123   : > { %v1520_v16 = vpop.f32.mrf.mxu1  ;;  %v559_v20 = vpop.f32.mrf.mxu0 }
 0x124   : > { %v1242_v16 = vld [vmem:[%s2215_s5 + $0x8] sm:$0xff] }
 0x125   : > { %v1542_v21 = vpop.f32.mrf.mxu0 }
 0x129   : > { %v485_v17 = vpop.f32.mrf.mxu1 }
 0x12a   : > { %900 = vrot.lane.b32.xlu1 %v485_v17, %s1807_s19  ;;  %728 = vrot.lane.b32.xlu0 %v485_v17, %s1808_s16 }
 0x12b   : > { %1544 = vmatpush3.xpose.msk.msra.mxu1 %vm563_vm2, %v485_v17  ;;  %v1531_v18 = vpop.f32.mrf.mxu1 }
 0x12c   : > { %1548 = vmatprep.subr.mxu1 %v1805_v0 }
 0x12e   : > { %1546 = vmatmul.mubr.msk.f32.vlgmr.msra.gmra.mxu1 %vm563_vm2, %v411_v19  ;;  %898 = vrot.lane.b32.xlu1 %v411_v19, %s1807_s19 }
 0x12f   : > { %726 = vrot.lane.b32.xlu0 %v411_v19, %s1808_s16  ;;  %1550 = vmatprep.mubr.msk.f32.mxu1 %vm1806_vm0, %v1805_v0 }
 0x130   : > { %1549 = vmatpush3.msra.mxu1 %v559_v20 }
 0x131   : > { %1558 = vmatprep.subr.mxu1 %v1805_v0 }
 0x132   : > { %1069 = vrot.lane.b32.xlu1 %v411_v19, %s1809_s11  ;;  %v1241_v19 = vld [vmem:[%s2215_s5] sm:$0xff] }
 0x133   : > { %1071 = vrot.lane.b32.xlu0 %v485_v17, %s1809_s11 }
 0x19c   : > { %v729_v22 = vpop.permute.xlu0 %728  ;;  %v901_v23 = vpop.permute.xlu1 %900 }
 0x19d   : > { %1554 = vmatpush3.xpose.msk.msra.mxu0 %vm563_vm2, %v729_v22 }
 0x19e   : > { %1563 = vmatprep.subr.mxu0 %v1805_v0 }
 0x1a0   : > { %v899_v25 = vpop.permute.xlu1 %898 }
 0x1a1   : > { %v727_v24 = vpop.permute.xlu0 %726 }
 0x1a2   : > { %1556 = vmatmul.mubr.msk.f32.vlgmr.msra.gmra.mxu0 %vm563_vm2, %v727_v24 }
 0x1a3   : > { %1564 = vmatpush3.xpose.msk.msra.mxu0 %vm563_vm2, %v901_v23  ;;  %1565 = vmatprep.mubr.msk.f32.mxu0 %vm1806_vm0, %v1805_v0 }
 0x1a4   : > { %1573 = vmatprep.subr.mxu0 %v1805_v0  ;;  %v1070_v27 = vpop.permute.xlu1 %1069 }
 0x1a5   : > { %v1072_v26 = vpop.permute.xlu0 %1071 }
 0x1a6   : > { %1566 = vmatmul.mubr.msk.f32.vlgmr.msra.gmra.mxu0 %vm563_vm2, %v899_v25 }
 0x1a7   : > { %1574 = vmatpush3.xpose.msk.msra.mxu0 %vm563_vm2, %v1072_v26  ;;  %1575 = vmatprep.mubr.msk.f32.mxu0 %vm1806_vm0, %v1805_v0 }
 0x1a8   : > { %1583 = vmatprep.subr.mxu0 %v1805_v0 }
 0x1aa   : > { %1576 = vmatmul.mubr.msk.f32.vlgmr.msra.gmra.mxu0 %vm563_vm2, %v1070_v27 }
 0x1ab   : > { %1599 = vmatprep.mubr.msk.f32.mxu0 %vm1806_vm0, %v1805_v0  ;;  %1584 = vmatpush3.msra.mxu0 %v1248_v7 }
 0x1ac   : > { %1585 = vmatprep.subr.mxu0 %v1805_v0 }
 0x1ad   : > { %1586 = vmatpush3.msra.mxu0 %v1247_v8 }
 0x1ae   : > { %1587 = vmatprep.subr.mxu0 %v1805_v0 }
 0x1af   : > { %1588 = vmatpush3.msra.mxu0 %v1246_v10 }
 0x1b0   : > { %1589 = vmatprep.subr.mxu0 %v1805_v0 }
 0x1b1   : > { %1590 = vmatpush3.msra.mxu0 %v1245_v11 }
 0x1b2   : > { %1591 = vmatprep.subr.mxu0 %v1805_v0 }
 0x1b3   : > { %1592 = vmatpush3.msra.mxu0 %v1244_v12 }
 0x1b4   : > { %1593 = vmatprep.subr.mxu0 %v1805_v0 }
 0x1b5   : > { %1594 = vmatpush3.msra.mxu0 %v1243_v13 }
 0x1b6   : > { %1595 = vmatprep.subr.mxu0 %v1805_v0 }
 0x1b7   : > { %1596 = vmatpush3.msra.mxu0 %v1242_v16 }
 0x1b8   : > { %1597 = vmatprep.subr.mxu0 %v1805_v0 }
 0x1b9   : > { %1598 = vmatpush3.msra.mxu0 %v1241_v19 }
 0x1ee   : > { %v636_v28 = vpop.f32.mrf.mxu1 }
 0x1ef   : > { %v641_v29 = vsel %vm640_vm3, %v636_v28, -inf }
 0x1f0   : > { %642 = vmax.xlane.f32.xlu0 %v641_v29  ;;  %v1547_v30 = vpop.f32.mrf.mxu1 }
 0x262   : > { %v800_v31 = vpop.f32.mrf.mxu0 }
 0x263   : > { %v804_v32 = vsel %vm640_vm3, %v800_v31, -inf }
 0x264   : > { %805 = vmax.xlane.f32.xlu1 %v804_v32  ;;  %v1557_v33 = vpop.f32.mrf.mxu0 }
 0x266   : > { %v972_v34 = vpop.f32.mrf.mxu0 }
 0x267   : > { %v976_v35 = vsel %vm640_vm3, %v972_v34, -inf }
 0x268   : > { %v1567_v36 = vpop.f32.mrf.mxu0  ;;  %977 = vmax.xlane.f32.xlu0 %v976_v35 }
 0x26a   : > { %v1143_v37 = vpop.f32.mrf.mxu0 }
 0x26b   : > { %v1147_v38 = vsel %vm640_vm3, %v1143_v37, -inf }
 0x26c   : > { %v1577_v39 = vpop.f32.mrf.mxu0  ;;  %1148 = vmax.xlane.f32.xlu0 %v1147_v38 }
 0x275   : > { %815 = vrot.lane.b32.xlu1 %v559_v20, %s1808_s16 }
 0x279   : > { %1157 = vrot.lane.b32.xlu1 %v559_v20, %s1809_s11  ;;  %v643_v40 = vpop.xlane.xlu0 %642 }
 0x27a   : > { %v644_v41 = vsub.f32 %v636_v28, %v643_v40 }
 0x27c   : > { %v645_v42 = vmul.f32 1.442695, %v644_v41 }
 0x27e   : > { %1661 = vpow2.f32 %v645_v42 }
 0x282   : > { %986 = vrot.lane.b32.xlu0 %v559_v20, %s1807_s19  ;;  %s1345_s19 = sshll.u32 %s330_s23, 4  ;;  %s1346_s19 = int_to_ptr.vmem [resolvable:$true] %s1345_s19 }
 0x283   : > { %s1733_s12 = scalar_lea.vmem %s1346_s19, 128  ;;  %p1740_p10 = scmp.lt.s32.totalorder %s1346_s19, %s1738_s29 }
 0x284   : > { %p1734_p13 = scmp.ne.s32.totalorder %s1346_s19, %s1733_s12 }
 0x286   : > { %p1735_p7 = pnand %p1734_p13, %p2236_p3 }
 0x288   : > { %p1736_p8 = pneg %p1735_p7 }
 0x28b   : > { %v1662_v43 = vpop.eup %1661 }
 0x28c   : > { %1551 = vmatmul.mubr.msk.f32.vlgmr.msra.gmra.mxu1 %vm640_vm3, %v1662_v43  ;;  %v647_v59 = vsel %vm640_vm3, %v1662_v43, 0.0 }
 0x28d   : > { %1560 = vmatprep.mubr.msk.f32.mxu1 %vm1806_vm0, %v1805_v0 }
 0x2ed   : > { %v806_v44 = vpop.xlane.xlu1 %805 }
 0x2ee   : > { %v807_v45 = vsub.f32 %v800_v31, %v806_v44  ;;  %v1464_v31 = vld [vmem:[%s2216_s6] ss:$0 sm:$0xff] }
 0x2f0   : > { %v808_v46 = vmul.f32 1.442695, %v807_v45 }
 0x2f1   : > { %v816_v47 = vpop.permute.xlu1 %815  ;;  %v978_v48 = vpop.xlane.xlu0 %977 }
 0x2f2   : > { %1663 = vpow2.f32 %v808_v46  ;;  %v979_v49 = vsub.f32 %v972_v34, %v978_v48  ;;  %1559 = vmatpush3.msra.mxu1 %v816_v47 }
 0x2f3   : > { %1568 = vmatprep.subr.mxu1 %v1805_v0 }
 0x2f4   : > { %v980_v50 = vmul.f32 1.442695, %v979_v49 }
 0x2f5   : > { %v1149_v51 = vpop.xlane.xlu0 %1148  ;;  %v1158_v58 = vpop.permute.xlu1 %1157 }
 0x2f6   : > { %1665 = vpow2.f32 %v980_v50  ;;  %v1150_v52 = vsub.f32 %v1143_v37, %v1149_v51 }
 0x2f8   : > { %v1151_v53 = vmul.f32 1.442695, %v1150_v52 }
 0x2f9   : > { %v987_v55 = vpop.permute.xlu0 %986 }
 0x2fa   : > { %1667 = vpow2.f32 %v1151_v53 }
 0x2ff   : > { %v1664_v54 = vpop.eup %1663 }
 0x300   : > { %1561 = vmatmul.mubr.msk.f32.vlgmr.msra.gmra.mxu1 %vm640_vm3, %v1664_v54  ;;  %v810_v56 = vsel %vm640_vm3, %v1664_v54, 0.0 }
 0x301   : > { %1569 = vmatpush3.msra.mxu1 %v987_v55  ;;  %811 = vadd.xlane.f32.xlu1 %v810_v56 }
 0x302   : > { %1570 = vmatprep.mubr.msk.f32.mxu1 %vm1806_vm0, %v1805_v0  ;;  %1578 = vmatprep.subr.mxu1 %v1805_v0 }
 0x303   : > { %v1666_v57 = vpop.eup %1665 }
 0x304   : > { %1571 = vmatmul.mubr.msk.f32.vlgmr.msra.gmra.mxu1 %vm640_vm3, %v1666_v57  ;;  %v982_v60 = vsel %vm640_vm3, %v1666_v57, 0.0 }
 0x305   : > { %1579 = vmatpush3.msra.mxu1 %v1158_v58  ;;  %648 = vadd.xlane.f32.xlu1 %v647_v59 }
 0x306   : > { %983 = vadd.xlane.f32.xlu0 %v982_v60  ;;  %1580 = vmatprep.mubr.msk.f32.mxu1 %vm1806_vm0, %v1805_v0 }
 0x307   : > { %v1668_v61 = vpop.eup %1667 }
 0x308   : > { %1581 = vmatmul.mubr.msk.f32.vlgmr.msra.gmra.mxu1 %vm640_vm3, %v1668_v61  ;;  %v1153_v62 = vsel %vm640_vm3, %v1668_v61, 0.0 }
 0x30a   : > { %1154 = vadd.xlane.f32.xlu0 %v1153_v62 }
 0x34c   : > { %v720_v63 = vpop.f32.mrf.mxu1 }
 0x34e   : > { %v1552_v1 = vpop.f32.mrf.mxu1 }
 0x38a   : > { %v812_v2 = vpop.xlane.xlu1 %811 }
 0x38e   : > { %v649_v3 = vpop.xlane.xlu1 %648 }
 0x38f   : > { %1669 = vrcp.f32 %v649_v3  ;;  %v984_v6 = vpop.xlane.xlu0 %983 }
 0x390   : > { %1671 = vrcp.f32 %v812_v2 }
 0x391   : > { %1673 = vrcp.f32 %v984_v6 }
 0x393   : > { %v1155_v9 = vpop.xlane.xlu0 %1154 }
 0x394   : > { %1675 = vrcp.f32 %v1155_v9 }
 0x39c   : > { %v1670_v4 = vpop.eup %1669 }
 0x39d   : > { %v724_v5 = vmul.f32 %v1670_v4, %v720_v63  ;;  %v1672_v14 = vpop.eup %1671 }
 0x39e   : > { %v1674_v20 = vpop.eup %1673 }
 0x39f   : > { %725 = vst.msk [vmem:[#allocation2] sm:$0xff] %vm563_vm2, %v724_v5 }
 0x3a1   : > { %v1676_v24 = vpop.eup %1675 }
 0x3c0   : > { %v887_v15 = vpop.f32.mrf.mxu1 }
 0x3c1   : > { %v891_v17 = vmul.f32 %v1672_v14, %v887_v15 }
 0x3c2   : > { %v1562_v18 = vpop.f32.mrf.mxu1 }
 0x3c3   : > { %893 = vrot.lane.b32.xlu0 %v891_v17, %s1810_s21  ;;  %s1739_s21 = scalar_lea.vmem %s1738_s29, 256 }
 0x3c4   : > { %v1058_v21 = vpop.f32.mrf.mxu1  ;;  %p1741_p2 = scmp.lt.s32.totalorder %s1739_s21, %s1733_s12 }
 0x3c5   : > { %v1062_v22 = vmul.f32 %v1674_v20, %v1058_v21 }
 0x3c6   : > { %v1572_v23 = vpop.f32.mrf.mxu1  ;;  %p1742_p4 = por %p1741_p2, %p1740_p10 }
 0x3c7   : > { %1064 = vrot.lane.b32.xlu1 %v1062_v22, %s1811_s15 }
 0x3c8   : > { %v1229_v25 = vpop.f32.mrf.mxu1  ;;  %p1743_p5 = pnand %p1742_p4, %p1736_p8 }
 0x3c9   : > { %v1233_v26 = vmul.f32 %v1676_v24, %v1229_v25 }
 0x3ca   : > { %v1582_v27 = vpop.f32.mrf.mxu1 }
 0x3cb   : > { %1235 = vrot.lane.b32.xlu1 %v1233_v26, %s1812_s9 }
 0x435   : > { %v894_v28 = vpop.permute.xlu0 %893 }
 0x436   : > { %897 = vst.msk [vmem:[#allocation2] sm:$0xff] %vm896_vm4, %v894_v28 }
 0x439   : > { %v1065_v29 = vpop.permute.xlu1 %1064 }
 0x43a   : > { %1068 = vst.msk [vmem:[#allocation2] sm:$0xff] %vm1067_vm5, %v1065_v29 }
 0x43d   : > { %v1236_v0 = vpop.permute.xlu1 %1235 }
 0x43e   : > { %1239 = vst.msk [vmem:[#allocation2] sm:$0xff] %vm1238_vm6, %v1236_v0 }
 0x445   : > { %v1240_v30 = vld [vmem:[#allocation2] sm:$0xff] }
 0x446   : > { %1600 = vmatmul.mubr.msk.f32.vlgmr.msra.gmra.mxu0 %vm1256_vm7, %v1240_v30 }
 0x506   : > { %v1326_v32 = vpop.f32.mrf.mxu0 }
 0x507   : > { %v1327_v33 = vadd.f32 %v1464_v31, %v1326_v32 }
 0x508   : > { %v1601_v34 = vpop.f32.mrf.mxu0 }
 0x509   : > { %1330 = vst.msk [vmem:[%s330_s23] sm:$0xff] %vm337_vm1, %v1327_v33 }
 0x50a   : > { %1746 = shalt.err (!%p1743_p5)
}
 0x50b   : > { %s1747_s15 = scalar_lea.hbm %s2172_s20, 128  ;;  %s1751_s8 = scalar_lea.hbm %s2217_s7, 256 }
 0x50c   : > { %p1748_p9 = scmp.ne.s32.totalorder %s2172_s20, %s1747_s15  ;;  %p1752_p12 = scmp.lt.s32.totalorder %s2172_s20, %s2217_s7 }
 0x50d   : > { %p1753_p1 = scmp.lt.s32.totalorder %s1751_s8, %s1747_s15 }
 0x50e   : > { %p1749_p0 = pnand %p1748_p9, %p2236_p3 }
 0x50f   : > { %p1754_p6 = por %p1753_p1, %p1752_p12 }
 0x510   : > { %p1750_p11 = pneg %p1749_p0 }
 0x512   : > { %p1755_p13 = pnand %p1754_p6, %p1750_p11 }
 0x514   : > { %1758 = shalt.err (!%p1755_p13)
}
 0x515   : > { %1606 = dma.vmem_to_hbm [thread:$0]  (%p2236_p3), %s1346_s19, 128, %s2172_s20, %s1332_s18  }
 0x516 PF: > { %s1357_s23 = sand.u32 1, %s1789_s24   ;;  %p2237_p7 = scmp.ne.s32.totalorder %s2226_s14, 0 }
 0x517   : > { %p2238_p8 = scmp.ge.s32.totalorder %s1801_s27, 2  ;;  %s1358_s16 = scalar_lea.sflag [#allocation5], %s1357_s23 }
 0x519   : > { %p1616_p10 = pnand %p2238_p8, %p2237_p7 }
 0x51b   : > { %p1617_p2 = pneg %p1616_p10 }
 0x51d   : > { %1784 = dma.done.wait (%p1617_p2), %s1358_s16, 128  }
 0x51e   : > { %1786 = vsyncadd (%p1617_p2), %s1358_s16, 4294967168  ;;  %p23_p4 = scmp.ge.s32.totalorder %s1879_s30, 4   ;;  %s2239_s24 = smov %s1793_s25 }
 0x51f   : > { %s2240_s25 = smov %s1797_s26  ;;  %s2241_s26 = smov %s1891_s10 }
 0x520   : > { %s2242_s27 = smov %s1879_s30  ;;  %25 = sbr.rel (!%p23_p4) target bundleno = 9 (0x9), region = 106 }
 0x525   :  { %1363 = vsyncpa [#allocation4], 1 }
 0x526   :  { %1365 = vsyncpa [#allocation4 + $0x1], 1 }
 0x527   :  { %1366 = vsyncpa [#allocation7], 1 }
 0x528   :  { %1368 = vsyncpa [#allocation7 + $0x1], 1 }
 0x529   :  { %1369 = vsyncpa [#allocation5], 1 }
 0x52a   :  { %1371 = vsyncpa [#allocation5 + $0x1], 1 }

</bundles_post_ra>
